<compile_context>
chip_gen: v6e
topology: v6e:2x2x1
jax: 0.10.0
libtpu: 0.0.40
codegen_flags: <defaults>
</compile_context>

<pallas_src>
import functools
import math

import jax
import jax.numpy as jnp
from jax import lax
from jax.experimental import pallas as pl
from jax.experimental.pallas import tpu as pltpu

_LANES = 128
_MAX_TILE_ROWS = 2048                    # 2048x128 f32 tile = 1 MiB per buffer
_VMEM_INPUT_BUDGET = 16 * 1024 * 1024    # double-buffered input bytes per grid step


def _round_up(x: int, m: int) -> int:
    return ((x + m - 1) // m) * m


def _num_tensorcores() -> int:
    """Best-effort TensorCore count (2 on v7x, 1 on v5e/v6e). Falls back to 1."""
    try:
        info = pltpu.get_tpu_info()
        for attr in ("tensorcores_per_chip", "num_tensorcores", "num_cores", "core_count"):
            n = getattr(info, attr, None)
            if isinstance(n, int) and 1 <= n <= 2:
                return n
    except Exception:
        pass
    return 1


def _focal_loss_kernel(logit_ref, target_ref, out_ref, acc_ref, *,
                       gamma: float, n_valid: int, cols: int, tile_rows: int,
                       tiles_per_split: int, needs_mask: bool, binary_targets: bool):
    c = pl.program_id(0)
    i = pl.program_id(1)

    @pl.when(i == 0)
    def _init():
        acc_ref[...] = jnp.zeros_like(acc_ref)

    # Widen on the VPU; inputs arrive in the caller's dtype (no wrapper cast pass).
    l = logit_ref[...].astype(jnp.float32)
    t = target_ref[...].astype(jnp.float32)

    # BCE-with-logits, numerically stable (identical to the PyTorch formulation):
    #   logit - logit*target + max(-logit,0) + log(exp(-max) + exp(-logit-max))
    #     == max(logit,0) - logit*target + log1p(exp(-|logit|))
    e_l = jnp.exp(-jnp.abs(l))
    sp_l = jnp.log1p(e_l)
    bce = jnp.maximum(l, 0.0) - l * t + sp_l

    # Focal factor: exp(gamma * logsigmoid(x)) with x = -logit*(2*target - 1).
    x = -l * (t * 2.0 - 1.0)
    if binary_targets:
        e_x = e_l                       # targets in {0,1}  =>  |x| == |logit|
    else:
        e_x = jnp.exp(-jnp.abs(x))

    gamma_is_small_int = float(gamma).is_integer() and 0.0 <= gamma <= 8.0
    if gamma_is_small_int:
        # focal = sigmoid(x)**gamma, stable sigmoid: 1 exp + 1 divide (no extra exp/log).
        p = jnp.where(x >= 0.0, 1.0, e_x) / (1.0 + e_x)
        focal = jnp.ones_like(p)
        for _ in range(int(gamma)):
            focal = focal * p
    else:
        log_sig = jnp.minimum(x, 0.0) - jnp.log1p(e_x)
        focal = jnp.exp(log_sig * gamma)

    loss = focal * bce

    if needs_mask:
        # Mask the ragged tail / out-of-bounds rows of partial edge blocks.
        row0 = (c * tiles_per_split + i) * tile_rows
        rows_iota = lax.broadcasted_iota(jnp.int32, loss.shape, 0) + row0
        cols_iota = lax.broadcasted_iota(jnp.int32, loss.shape, 1)
        flat_idx = rows_iota * cols + cols_iota
        loss = jnp.where(flat_idx < n_valid, loss, 0.0)

    # Tiny (8, cols) accumulator: fold the tile's sublane groups with whole-vreg adds.
    g = loss.shape[0] // 8
    acc_ref[...] += loss.reshape(g, 8, loss.shape[1]).sum(axis=0)

    @pl.when(i == pl.num_programs(1) - 1)
    def _finalize():
        out_ref[0] = acc_ref[...]


def focal_loss_pallas(logit: jax.Array, target: jax.Array, gamma: float = 2.0, *,
                      binary_targets: bool = False,
                      num_core_splits: int | None = None) -> jax.Array:
    """Focal loss matching the PyTorch module's forward.

    binary_targets=True is a fast path that is ONLY valid when every target is
    exactly 0 or 1 (it reuses exp(-|logit|) for the focal term).
    """
    assert logit.shape == target.shape
    n_elems = math.prod(logit.shape)
    # PyTorch module: 2-D -> loss.sum(dim=1).mean() == total / N; otherwise loss.mean().
    denom = logit.shape[0] if logit.ndim == 2 else n_elems

    # Present the elementwise problem as a 2-D (rows, cols) slab with NO extra
    # wrapper-side pad/cast passes (the op is HBM-bound).
    if n_elems % _LANES == 0:
        rows, cols = n_elems // _LANES, _LANES
        l2d = logit.reshape(rows, cols)
        t2d = target.reshape(rows, cols)
    elif logit.ndim == 2:
        l2d, t2d = logit, target
        rows, cols = logit.shape
    else:
        # Rare ragged non-2-D case: minimal zero pad to a lane multiple; the pad
        # region is masked out in-kernel via the flat-index mask.
        pad = _round_up(n_elems, _LANES) - n_elems
        l2d = jnp.pad(logit.reshape(-1), (0, pad)).reshape(-1, _LANES)
        t2d = jnp.pad(target.reshape(-1), (0, pad)).reshape(-1, _LANES)
        rows, cols = l2d.shape

    splits = num_core_splits if num_core_splits is not None else _num_tensorcores()
    splits = max(1, min(splits, pl.cdiv(rows, 8)))

    rows_per_split = pl.cdiv(rows, splits)
    bytes_per_row = cols * (l2d.dtype.itemsize + t2d.dtype.itemsize)
    budget_rows = max(8, (_VMEM_INPUT_BUDGET // (2 * bytes_per_row)) // 8 * 8)
    tile_rows = min(_MAX_TILE_ROWS, budget_rows, _round_up(rows_per_split, 8))
    tiles_per_split = pl.cdiv(rows_per_split, tile_rows)
    needs_mask = splits * tiles_per_split * tile_rows * cols > n_elems

    kernel = functools.partial(
        _focal_loss_kernel, gamma=float(gamma), n_valid=n_elems, cols=cols,
        tile_rows=tile_rows, tiles_per_split=tiles_per_split,
        needs_mask=needs_mask, binary_targets=binary_targets)

    row_block = lambda c, i: (c * tiles_per_split + i, 0)
    if splits > 1:
        # Only CORE_PARALLEL actually shards a grid axis across TensorCores (v7x).
        dim_sem = (pltpu.CORE_PARALLEL, pltpu.ARBITRARY)
    else:
        dim_sem = ("arbitrary", "arbitrary")

    partials = pl.pallas_call(
        kernel,
        out_shape=jax.ShapeDtypeStruct((splits, 8, cols), jnp.float32),
        grid_spec=pltpu.PrefetchScalarGridSpec(
            num_scalar_prefetch=0,
            grid=(splits, tiles_per_split),
            in_specs=[
                pl.BlockSpec((tile_rows, cols), row_block),
                pl.BlockSpec((tile_rows, cols), row_block),
            ],
            out_specs=pl.BlockSpec((1, 8, cols), lambda c, i: (c, 0, 0)),
            scratch_shapes=[pltpu.VMEM((8, cols), jnp.float32)],
        ),
        compiler_params=pltpu.CompilerParams(
            dimension_semantics=dim_sem,
            vmem_limit_bytes=32 * 1024 * 1024,
        ),
    )(l2d, t2d)

    # Final cross-lane reduce + mean on the tiny partial-sum output.
    return jnp.sum(partials) / jnp.float32(denom)


def focal_loss_ref(logit, target, gamma=2.0):
    # Pure-JAX reference mirroring the PyTorch forward (for sanity checking).
    logit = logit.astype(jnp.float32)
    target = target.astype(jnp.float32)
    max_val = jnp.maximum(-logit, 0.0)
    loss = logit - logit * target + max_val + jnp.log(
        jnp.exp(-max_val) + jnp.exp(-logit - max_val))
    invprobs = jax.nn.log_sigmoid(-logit * (target * 2.0 - 1.0))
    loss = jnp.exp(invprobs * gamma) * loss
    if loss.ndim == 2:
        loss = loss.sum(axis=1)
    return loss.mean()


if __name__ == "__main__":
    key = jax.random.PRNGKey(0)
    k1, k2, k3, k4, k5, k6 = jax.random.split(key, 6)

    # Case 1: batch=8, classes=32, binary multi-label targets (lane-dense fast path,
    # integer-gamma fast path, in-kernel masking of the partial edge block).
    logit = jax.random.normal(k1, (8, 32), dtype=jnp.float32)
    target = (jax.random.uniform(k2, (8, 32)) > 0.5).astype(jnp.float32)
    out = jax.block_until_ready(focal_loss_pallas(logit, target, gamma=2, binary_targets=True))
    ref = focal_loss_ref(logit, target, gamma=2)
    assert jnp.allclose(out, ref, atol=1e-5, rtol=1e-5), (out, ref)

    # Case 2: 2-D with C not a lane multiple + soft targets (full-row blocks, no pad).
    logit2 = jax.random.normal(k3, (16, 100), dtype=jnp.float32)
    target2 = jax.random.uniform(k4, (16, 100), dtype=jnp.float32)
    out2 = jax.block_until_ready(focal_loss_pallas(logit2, target2, gamma=2.0))
    ref2 = focal_loss_ref(logit2, target2, gamma=2.0)
    assert jnp.allclose(out2, ref2, atol=1e-5, rtol=1e-5), (out2, ref2)

    # Case 3: non-2-D ragged shape + non-integer gamma (exercises tail masking and
    # the exp(gamma * logsigmoid) general path).
    logit3 = jax.random.normal(k5, (4, 5, 17), dtype=jnp.float32)
    target3 = jax.random.uniform(k6, (4, 5, 17), dtype=jnp.float32)
    out3 = jax.block_until_ready(focal_loss_pallas(logit3, target3, gamma=1.5))
    ref3 = focal_loss_ref(logit3, target3, gamma=1.5)
    assert jnp.allclose(out3, ref3, atol=1e-5, rtol=1e-5), (out3, ref3)

    print("KERNEL_OK")
</pallas_src>

<mosaic_0001>
module attributes {stable_mosaic.version = 11 : i64} {
  func.func @_focal_loss_kernel(%arg0: i32, %arg1: i32, %arg2: memref<8x128xf32, #tpu.memory_space<vmem>>, %arg3: memref<8x128xf32, #tpu.memory_space<vmem>>, %arg4: memref<1x8x128xf32, #tpu.memory_space<vmem>>, %arg5: memref<8x128xf32, #tpu.memory_space<vmem>>) attributes {dimension_semantics = [#tpu.dimension_semantics<arbitrary>, #tpu.dimension_semantics<arbitrary>], iteration_bounds = array<i64: 1, 1>, scalar_prefetch = 0 : i64, scratch_operands = 1 : i64, tpu.core_type = #tpu.core_type<tc>, window_params = [{transform_indices = @transform_0, window_bounds = array<i64: 8, 128>}, {transform_indices = @transform_1, window_bounds = array<i64: 8, 128>}, {transform_indices = @transform_2, window_bounds = array<i64: 1, 8, 128>}]} {
    %c0_i32 = arith.constant 0 : i32
    %0 = arith.cmpi eq, %arg1, %c0_i32 : i32
    %1 = arith.extui %0 : i1 to i32
    %c0_i32_0 = arith.constant 0 : i32
    %2 = arith.cmpi ne, %1, %c0_i32_0 : i32
    scf.if %2 {
      %cst_20 = arith.constant 0.000000e+00 : f32
      %55 = vector.broadcast %cst_20 : f32 to vector<8x128xf32>
      %c0_21 = arith.constant 0 : index
      %c0_22 = arith.constant 0 : index
      %56 = vector.load %arg5[%c0_21, %c0_22] : memref<8x128xf32, #tpu.memory_space<vmem>>, vector<8x128xf32>
      tpu.vector_store %arg5[%c0_21, %c0_22], %55 {strides = array<i32>} : memref<8x128xf32, #tpu.memory_space<vmem>>, vector<8x128xf32>,
    } else {
    }
    %c0 = arith.constant 0 : index
    %c0_1 = arith.constant 0 : index
    %3 = vector.load %arg2[%c0, %c0_1] : memref<8x128xf32, #tpu.memory_space<vmem>>, vector<8x128xf32>
    %c0_2 = arith.constant 0 : index
    %c0_3 = arith.constant 0 : index
    %4 = vector.load %arg3[%c0_2, %c0_3] : memref<8x128xf32, #tpu.memory_space<vmem>>, vector<8x128xf32>
    %5 = math.absf %3 : vector<8x128xf32>
    %cst = arith.constant 0.000000e+00 : f32
    %6 = vector.broadcast %cst : f32 to vector<8x128xf32>
    %7 = arith.subf %6, %5 : vector<8x128xf32>
    %8 = math.exp %7 : vector<8x128xf32>
    %9 = math.log1p %8 : vector<8x128xf32>
    %cst_4 = arith.constant 0.000000e+00 : f32
    %10 = vector.broadcast %cst_4 : f32 to vector<8x128xf32>
    %11 = arith.maximumf %3, %10 : vector<8x128xf32>
    %12 = arith.mulf %3, %4 : vector<8x128xf32>
    %13 = arith.subf %11, %12 : vector<8x128xf32>
    %14 = arith.addf %13, %9 : vector<8x128xf32>
    %cst_5 = arith.constant 0.000000e+00 : f32
    %15 = vector.broadcast %cst_5 : f32 to vector<8x128xf32>
    %16 = arith.subf %15, %3 : vector<8x128xf32>
    %cst_6 = arith.constant 2.000000e+00 : f32
    %17 = vector.broadcast %cst_6 : f32 to vector<8x128xf32>
    %18 = arith.mulf %4, %17 : vector<8x128xf32>
    %cst_7 = arith.constant 1.000000e+00 : f32
    %19 = vector.broadcast %cst_7 : f32 to vector<8x128xf32>
    %20 = arith.subf %18, %19 : vector<8x128xf32>
    %21 = arith.mulf %16, %20 : vector<8x128xf32>
    %cst_8 = arith.constant 0.000000e+00 : f32
    %22 = vector.broadcast %cst_8 : f32 to vector<8x128xf32>
    %23 = arith.cmpf oge, %21, %22 : vector<8x128xf32>
    %cst_9 = arith.constant 1.000000e+00 : f32
    %24 = vector.broadcast %cst_9 : f32 to vector<8x128xf32>
    %25 = arith.select %23, %24, %8 : vector<8x128xi1>, vector<8x128xf32>
    %cst_10 = arith.constant 1.000000e+00 : f32
    %26 = vector.broadcast %cst_10 : f32 to vector<8x128xf32>
    %27 = arith.addf %26, %8 : vector<8x128xf32>
    %28 = arith.divf %25, %27 : vector<8x128xf32>
    %cst_11 = arith.constant 1.000000e+00 : f32
    %29 = vector.broadcast %cst_11 : f32 to vector<8x128xf32>
    %30 = arith.mulf %29, %28 : vector<8x128xf32>
    %31 = arith.mulf %30, %28 : vector<8x128xf32>
    %32 = arith.mulf %31, %14 : vector<8x128xf32>
    %c1_i32 = arith.constant 1 : i32
    %33 = arith.muli %arg0, %c1_i32 : i32
    %34 = arith.addi %33, %arg1 : i32
    %c8_i32 = arith.constant 8 : i32
    %35 = arith.muli %34, %c8_i32 : i32
    %36 = tpu.iota {dimensions = array<i32: 0>} : vector<8x128xi32>
    %37 = vector.broadcast %35 : i32 to vector<8x128xi32>
    %38 = arith.addi %36, %37 : vector<8x128xi32>
    %39 = tpu.iota {dimensions = array<i32: 1>} : vector<8x128xi32>
    %c128_i32 = arith.constant 128 : i32
    %40 = vector.broadcast %c128_i32 : i32 to vector<8x128xi32>
    %41 = arith.muli %38, %40 : vector<8x128xi32>
    %42 = arith.addi %41, %39 : vector<8x128xi32>
    %c256_i32 = arith.constant 256 : i32
    %43 = vector.broadcast %c256_i32 : i32 to vector<8x128xi32>
    %44 = arith.cmpi slt, %42, %43 : vector<8x128xi32>
    %cst_12 = arith.constant 0.000000e+00 : f32
    %45 = vector.broadcast %cst_12 : f32 to vector<8x128xf32>
    %46 = arith.select %44, %32, %45 : vector<8x128xi1>, vector<8x128xf32>
    %c0_13 = arith.constant 0 : index
    %c0_14 = arith.constant 0 : index
    %47 = vector.load %arg5[%c0_13, %c0_14] : memref<8x128xf32, #tpu.memory_space<vmem>>, vector<8x128xf32>
    %48 = vector.shape_cast %46 : vector<8x128xf32> to vector<1x8x128xf32>
    %cst_15 = arith.constant dense<0.000000e+00> : vector<8x128xf32>
    %49 = vector.multi_reduction <add>, %48, %cst_15 [0] : vector<1x8x128xf32> to vector<8x128xf32>
    %50 = arith.addf %47, %49 : vector<8x128xf32>
    %c0_16 = arith.constant 0 : index
    %c0_17 = arith.constant 0 : index
    %51 = vector.load %arg5[%c0_16, %c0_17] : memref<8x128xf32, #tpu.memory_space<vmem>>, vector<8x128xf32>
    tpu.vector_store %arg5[%c0_16, %c0_17], %50 {strides = array<i32>} : memref<8x128xf32, #tpu.memory_space<vmem>>, vector<8x128xf32>,
    %c0_i32_18 = arith.constant 0 : i32
    %52 = arith.cmpi eq, %arg1, %c0_i32_18 : i32
    %53 = arith.extui %52 : i1 to i32
    %c0_i32_19 = arith.constant 0 : i32
    %54 = arith.cmpi ne, %53, %c0_i32_19 : i32
    scf.if %54 {
      %c0_20 = arith.constant 0 : index
      %c0_21 = arith.constant 0 : index
      %55 = vector.load %arg5[%c0_20, %c0_21] : memref<8x128xf32, #tpu.memory_space<vmem>>, vector<8x128xf32>
      %c0_22 = arith.constant 0 : index
      %c0_23 = arith.constant 0 : index
      %c0_24 = arith.constant 0 : index
      %56 = vector.load %arg4[%c0_22, %c0_23, %c0_24] : memref<1x8x128xf32, #tpu.memory_space<vmem>>, vector<1x8x128xf32>
      %57 = vector.shape_cast %56 : vector<1x8x128xf32> to vector<8x128xf32>
      %58 = vector.shape_cast %55 : vector<8x128xf32> to vector<1x8x128xf32>
      tpu.vector_store %arg4[%c0_22, %c0_23, %c0_24], %58 {strides = array<i32>} : memref<1x8x128xf32, #tpu.memory_space<vmem>>, vector<1x8x128xf32>,
    } else {
    }
    return
  }
  func.func @transform_0(%arg0: i32, %arg1: i32) -> (i32, i32) {
    %c1_i32 = arith.constant 1 : i32
    %0 = arith.muli %arg0, %c1_i32 : i32
    %1 = arith.addi %0, %arg1 : i32
    %c0_i32 = arith.constant 0 : i32
    %c0_i32_0 = arith.constant 0 : i32
    return %1, %c0_i32 : i32, i32
  }
  func.func @transform_1(%arg0: i32, %arg1: i32) -> (i32, i32) {
    %c1_i32 = arith.constant 1 : i32
    %0 = arith.muli %arg0, %c1_i32 : i32
    %1 = arith.addi %0, %arg1 : i32
    %c0_i32 = arith.constant 0 : i32
    %c0_i32_0 = arith.constant 0 : i32
    return %1, %c0_i32 : i32, i32
  }
  func.func @transform_2(%arg0: i32, %arg1: i32) -> (i32, i32, i32) {
    %c0_i32 = arith.constant 0 : i32
    %c0_i32_0 = arith.constant 0 : i32
    %c0_i32_1 = arith.constant 0 : i32
    return %arg0, %c0_i32, %c0_i32_0 : i32, i32, i32
  }
}

</mosaic_0001>

<bundles_post_ra>
// kernel: tpu_custom_call.1
= control target key start
LH: loop header
LB: loop body
LE: loop exit
PB: predicated region body
PF: predicated region fallthrough
CT: control target
= control target key end

     0   :  { %7 = vsyncpa [#allocation4], 0  ;;  %s243_s0 = inlined_call_operand.hbm [shape: f32[2,128], index: 0, kind: input, shape index: {}]   ;;  %s244_s1 = inlined_call_operand.hbm [shape: f32[2,128], index: 1, kind: input, shape index: {}]   ;;  %s245_s2 = inlined_call_operand.hbm [shape: f32[1,8,128], index: 2, kind: output, shape index: {}]  }
   0x1   :  { %8 = vsyncpa [#allocation7], 0 }
   0x2   :  { %9 = vsyncpa [#allocation5], 0 }
   0x3   :  { %18 = vsyncadd [#allocation4], 96  ;;  %s214_s9 = smov [#allocation3]  }
   0x4   :  { %s23_s10 = sshll.u32 %s214_s9, 4  ;;  %s24_s10 = int_to_ptr.vmem [resolvable:$true] %s23_s10 }
   0x5   :  { %s156_s11 = scalar_lea.vmem %s24_s10, 32  ;;  %s160_s12 = scalar_lea.vmem %s24_s10, 128 }
   0x6   :  { %p157_p0 = scmp.ne.s32.totalorder %s24_s10, %s156_s11  ;;  %p161_p1 = scmp.lt.s32.totalorder %s24_s10, %s24_s10 }
   0x7   :  { %p162_p2 = scmp.lt.s32.totalorder %s160_s12, %s156_s11 }
   0x9   :  { %p163_p3 = por %p162_p2, %p161_p1 }
   0xb   :  { %p164_p4 = pnand %p163_p3, %p157_p0 }
   0xd   :  { %167 = shalt.err (!%p164_p4)
}
   0xe   :  { %s215_s13 = smov 32   ;;  %s216_s14 = smov 2  }
   0xf   :  { %29 = dma.hbm_to_vmem [thread:$0]  %s243_s0, 32, %s24_s10, [#allocation4], %s215_s13, %s215_s13, %s216_s14  }
  0x10   :  { %38 = vsyncadd [#allocation7], 96  ;;  %s217_s17 = smov [#allocation6]  }
  0x11   :  { %s43_s18 = sshll.u32 %s217_s17, 4  ;;  %s44_s18 = int_to_ptr.vmem [resolvable:$true] %s43_s18 }
  0x12   :  { %s176_s19 = scalar_lea.vmem %s44_s18, 32  ;;  %s180_s20 = scalar_lea.vmem %s44_s18, 128 }
  0x13   :  { %p177_p5 = scmp.ne.s32.totalorder %s44_s18, %s176_s19  ;;  %p181_p6 = scmp.lt.s32.totalorder %s44_s18, %s44_s18 }
  0x14   :  { %p182_p7 = scmp.lt.s32.totalorder %s180_s20, %s176_s19 }
  0x16   :  { %p183_p8 = por %p182_p7, %p181_p6 }
  0x18   :  { %p184_p9 = pnand %p183_p8, %p177_p5 }
  0x1a   :  { %187 = shalt.err (!%p184_p9)
}
  0x1b   :  { %49 = dma.hbm_to_vmem [thread:$0]  %s244_s1, 32, %s44_s18, [#allocation7], %s215_s13, %s215_s13, %s216_s14  }
  0x1c   :  { %208 = dma.done.wait [#allocation4], 128  }
  0x1d   :  { %209 = vsyncadd [#allocation4], 4294967168 }
  0x1e   :  { %210 = dma.done.wait [#allocation7], 128  }
  0x1f   :  { %211 = vsyncadd [#allocation7], 4294967168  ;;  %v69_v0 = vld [vmem:[#allocation3] sm:$0xff]  ;;  %v70_v4 = vld [vmem:[#allocation6] sm:$0xff]  ;;  %v101_v10 = vlaneseq  ;;  %s218_s0 = smov [#allocation8]  }
  0x20   :  { %v71_v1 = vand.u32 2147483647, %v69_v0  ;;  %v89_v6 = vmul.f32 2.0, %v70_v4  ;;  %v88_v8 = vsub.f32 0.0, %v69_v0  ;;  %v84_v16 = vmax.f32 %v69_v0, 0.0  ;;  %s126_s1 = sshll.u32 %s218_s0, 4  ;;  %s127_s1 = int_to_ptr.vmem [resolvable:$true] %s126_s1 }
  0x21   :  { %v102_v13 = vshrl.u32 %v101_v10, 7  ;;  %v85_v17 = vmul.f32 %v70_v4, %v69_v0  ;;  %v106_v18 = vand.u32 127, %v101_v10  ;;  %s188_s23 = scalar_lea.vmem %s127_s1, 128  ;;  %p193_p11 = scmp.lt.s32.totalorder %s127_s1, %s127_s1 }
  0x22   :  { %v72_v2 = vsub.f32 0.0, %v71_v1  ;;  %v136_v9 = vadd.f32 -1.0, %v89_v6  ;;  %p189_p10 = scmp.ne.s32.totalorder %s127_s1, %s188_s23  ;;  %p194_p12 = scmp.lt.s32.totalorder %s188_s23, %s188_s23 }
  0x23   :  { %v107_v19 = vmul.u32 128, %v102_v13  ;;  %v86_v23 = vsub.f32 %v84_v16, %v85_v17 }
  0x24   :  { %v73_v3 = vmul.f32 1.442695, %v72_v2  ;;  %v91_v12 = vmul.f32 %v136_v9, %v88_v8  ;;  %p195_p13 = por %p194_p12, %p193_p11 }
  0x25   :  { %v108_v26 = vadd.s32 %v107_v19, %v106_v18 }
  0x26   :  { %142 = vpow2.f32 %v73_v3  ;;  %vm92_vm0 = vcmp.ge.f32.partialorder %v91_v12, 0.0  ;;  %p196_p0 = pnand %p195_p13, %p189_p10 }
  0x27   :  { %vm109_vm2 = vcmp.lt.s32.totalorder %v108_v26, 256 }
  0x33   :  { %v143_v5 = vpop.eup %142 }
  0x34   :  { %v75_v7 = vadd.f32 1.0, %v143_v5  ;;  %v78_v11 = vmul.f32 -0.5, %v143_v5  ;;  %v81_v15 = vand.u32 2147483647, %v143_v5  ;;  %v93_v21 = vsel %vm92_vm0, 1.0, %v143_v5 }
  0x36   :  { %144 = vlog2.f32 %v75_v7  ;;  %v79_v14 = vadd.f32 1.0, %v78_v11  ;;  %vm82_vm1 = vcmp.lt.f32.partialorder %v81_v15, 0.0004427343 }
  0x37   :  { %146 = vrcp.f32 %v75_v7 }
  0x38   :  { %v80_v20 = vmul.f32 %v143_v5, %v79_v14 }
  0x43   :  { %v145_v22 = vpop.eup %144 }
  0x44   :  { %v147_v24 = vpop.eup %146  ;;  %v77_v25 = vmul.f32 0.6931472, %v145_v22 }
  0x45   :  { %v96_v27 = vmul.f32 %v147_v24, %v93_v21 }
  0x46   :  { %v83_v28 = vsel %vm82_vm1, %v80_v20, %v77_v25 }
  0x47   :  { %v87_v29 = vadd.f32 %v86_v23, %v83_v28  ;;  %v97_v30 = vmul.f32 %v96_v27, %v96_v27 }
  0x49   :  { %v98_v31 = vmul.f32 %v97_v30, %v87_v29 }
  0x4b   :  { %v110_v32 = vsel %vm109_vm2, %v98_v31, 0.0 }
  0x4c   :  { %119 = vst [vmem:[#allocation8] sm:$0xff] %v110_v32 }
  0x4d   :  { %199 = shalt.err (!%p196_p0)
}
  0x4e   :  { %129 = dma.vmem_to_hbm [thread:$0]  %s127_s1, 128, %s245_s2, [#allocation5]  }
  0x4f   :  { %212 = dma.done.wait [#allocation5], 128  }
  0x50   :  { %213 = vsyncadd [#allocation5], 4294967168 }
  0x51   :  { %133 = vsyncpa [#allocation4], 1 }
  0x52   :  { %134 = vsyncpa [#allocation7], 1 }
  0x53   :  { %135 = vsyncpa [#allocation5], 1 }

</bundles_post_ra>
